<compile_context>
chip_gen: v5e
topology: v5e:2x2
jax: 0.10.0
libtpu: 0.0.40
codegen_flags: <defaults>
</compile_context>

<pallas_src>
import functools
import numpy as np
import jax
import jax.numpy as jnp
from jax.experimental import pallas as pl
from jax.experimental.pallas import tpu as pltpu

D = 32               # embeddings_dimension (hidden size of the text model)
NUM_HEADS = 4
HEAD_DIM = D // NUM_HEADS
_HP = jax.lax.Precision.HIGHEST   # only used by the pure-JAX reference


# --------------------------------------------------------------------------- #
# Fused kernel: cross attention for ref group b  +  scoring of its hyp groups
# --------------------------------------------------------------------------- #
def _fused_kernel(ref_ref, mask_ref, hyp_ref, w_kq_ref, b_kq_ref,
                  w_vf_ref, b_vf_ref, w_out_ref, c0_ref, out_ref):
    ref_e = ref_ref[0]                                   # (Lr, D) padded ref entities
    bias = mask_ref[0] - 1e-09                           # (Lr, 1) float attn_mask (ref-faithful)

    # Per-head attention logits with the constant query folded into the weight:
    #   s[k, h] = (q_h . k_h[k]) / sqrt(head_dim) + attn_mask[k]
    s = (jnp.dot(ref_e, w_kq_ref[...], preferred_element_type=jnp.float32)
         + b_kq_ref[...] + bias)                         # (Lr, NH)

    # Per-head softmax over the key (sublane) axis; EUP reciprocal.
    s = s - jnp.max(s, axis=0, keepdims=True)
    p = jnp.exp(s)
    p = p * pl.reciprocal(jnp.sum(p, axis=0, keepdims=True), approx=True)

    # Value path folded through out_proj and output_layer:
    #   vw[k, h] = sum_{d in head h} V[k, d] * (w_out @ W_o)[d]
    vw = (jnp.dot(ref_e, w_vf_ref[...], preferred_element_type=jnp.float32)
          + b_vf_ref[...])                               # (Lr, NH)
    glob_dot = jnp.sum(p * vw, keepdims=True)            # (1, 1) = global.w_out - b_o.w_out

    # Fused scoring of all hyp_num hypothesis groups of this batch element.
    # repeat_interleave(global, hyp_num) followed by Linear(D->1) reduces to a
    # scalar broadcast add on the logits.
    hyp = hyp_ref[0]                                     # (N, D) = (hyp_num*Lh, D)
    logits = jnp.einsum('od,ld->ol', w_out_ref[...], hyp,
                        preferred_element_type=jnp.float32)          # (1, N)
    logits = logits + glob_dot + c0_ref[0, 0]
    out_ref[...] = jax.nn.sigmoid(9.0 * logits).reshape(1, 1, -1)


# --------------------------------------------------------------------------- #
# Wrapper
# --------------------------------------------------------------------------- #
@functools.partial(jax.jit, static_argnums=(5,))
def entity_cross_encoder_forward(params, hyp_entity_pad, hyp_mask,
                                 ref_entity_pad, ref_mask, hyp_num):
    """hyp_entity_pad: (G, Lh, D) with G = batch_size * hyp_num
       ref_entity_pad: (B, Lr, D);  ref_mask: (B, 1, Lr);  hyp_mask unused
       (the reference only computes hyp_mask + 1e-30 and never uses it)."""
    del hyp_mask
    B, Lr, _ = ref_entity_pad.shape
    G, Lh, _ = hyp_entity_pad.shape
    assert G == B * hyp_num
    N = hyp_num * Lh

    w_in = params['attn_in_proj_w']            # (3D, D), PyTorch [out, in] layout
    b_in = params['attn_in_proj_b']            # (3D,)
    w_o = params['attn_out_proj_w']            # (D, D)
    b_o = params['attn_out_proj_b']            # (D,)
    w_out = params['output_w'].reshape(1, D)   # (1, D)
    b_out = params['output_b']                 # (1,)
    scale = 1.0 / float(np.sqrt(HEAD_DIM))

    # Head selector: h_sum[d, h] = 1 iff embedding dim d belongs to head h.
    h_sum = (jnp.arange(D)[:, None] // HEAD_DIM
             == jnp.arange(NUM_HEADS)[None, :]).astype(jnp.float32)         # (D, NH)

    # ---- exact weight folding (tiny, once per call, fused under jit) -------
    # Query path: same q for every group -> fold q-proj + scale + per-head dot.
    glob = params['global_embeddings'].reshape(1, D)
    q_scaled = (jnp.dot(glob, w_in[:D].T) + b_in[:D][None, :]) * scale       # (1, D)
    w_kq = jnp.dot(w_in[D:2 * D].T * q_scaled, h_sum)                        # (D, NH)
    b_kq = jnp.dot(b_in[D:2 * D][None, :] * q_scaled, h_sum)                 # (1, NH)

    # Value path: out_proj composed with output_layer is rank-1 -> fold.
    w_fold = jnp.dot(w_out, w_o)                                             # (1, D)
    w_vf = jnp.dot(w_in[2 * D:].T * w_fold, h_sum)                           # (D, NH)
    b_vf = jnp.dot(b_in[2 * D:][None, :] * w_fold, h_sum)                    # (1, NH)
    c0 = (jnp.dot(b_o, w_out[0]) + b_out[0]).reshape(1, 1)                   # scalar -> SMEM

    mask_t = jnp.swapaxes(ref_mask, 1, 2)        # (B, Lr, 1): key mask on the sublane axis
    hyp_flat = hyp_entity_pad.reshape(B, N, D)   # pack the hyp groups of each batch element

    out = pl.pallas_call(
        _fused_kernel,
        out_shape=jax.ShapeDtypeStruct((B, 1, N), jnp.float32),
        grid_spec=pltpu.PrefetchScalarGridSpec(
            num_scalar_prefetch=0,
            grid=(B,),
            in_specs=[
                pl.BlockSpec((1, Lr, D), lambda b: (b, 0, 0)),     # ref entities
                pl.BlockSpec((1, Lr, 1), lambda b: (b, 0, 0)),     # ref mask
                pl.BlockSpec((1, N, D), lambda b: (b, 0, 0)),      # hyp entities (all hyp groups)
                pl.BlockSpec((D, NUM_HEADS), lambda b: (0, 0)),    # folded q.K weight
                pl.BlockSpec((1, NUM_HEADS), lambda b: (0, 0)),    # folded q.K bias
                pl.BlockSpec((D, NUM_HEADS), lambda b: (0, 0)),    # folded V/out weight
                pl.BlockSpec((1, NUM_HEADS), lambda b: (0, 0)),    # folded V/out bias
                pl.BlockSpec((1, D), lambda b: (0, 0)),            # output_layer weight
                pl.BlockSpec((1, 1), lambda b: (0, 0),
                             memory_space=pltpu.MemorySpace.SMEM), # fused scalar bias
            ],
            out_specs=pl.BlockSpec((1, 1, N), lambda b: (b, 0, 0)),
        ),
        compiler_params=pltpu.CompilerParams(dimension_semantics=("parallel",)),
    )(ref_entity_pad.astype(jnp.float32), mask_t.astype(jnp.float32),
      hyp_flat.astype(jnp.float32), w_kq.astype(jnp.float32),
      b_kq.astype(jnp.float32), w_vf.astype(jnp.float32),
      b_vf.astype(jnp.float32), w_out.astype(jnp.float32),
      c0.astype(jnp.float32))

    # TODO(synk): number_layer (global_number) and fuse_attn are computed /
    # declared by the reference but never used in the returned score; omitted
    # as dead code.
    return out.reshape(G, Lh)   # (batch_size * hyp_num, max_hyp_len)


# --------------------------------------------------------------------------- #
# Glue: embedding lookups + ragged split / pad (matches split_embeddings /
# pad_tensor_list from the reference)
# --------------------------------------------------------------------------- #
def embed_and_pad(token_ids, label_ids, rel_ids, lengths, params):
    emb = (params['token_emb'][token_ids]
           + params['label_emb'][label_ids]
           + params['rel_emb'][rel_ids])                       # (total, D)
    max_len = max(lengths)
    mask = np.zeros((len(lengths), max_len), np.float32)
    padded, off = [], 0
    for i, L in enumerate(lengths):
        g = emb[off:off + L]
        pad = jnp.zeros((max_len - L, D), emb.dtype)
        padded.append(jnp.concatenate([g, pad], axis=0))
        mask[i, :L] = 1.0
        off += L
    padded = jnp.stack(padded)                                  # (num_groups, max_len, D)
    mask = jnp.asarray(mask)[:, None, :]                        # (num_groups, 1, max_len)
    return padded, mask


def init_params(key):
    ks = jax.random.split(key, 7)
    s = 0.02
    return {
        'token_emb': jax.random.normal(ks[0], (10000, D), jnp.float32) * s,   # entity_token_layer
        'label_emb': jax.random.normal(ks[1], (4, D), jnp.float32) * s,       # entity_label_layer
        'rel_emb':   jax.random.normal(ks[2], (2, D), jnp.float32) * s,       # relation_layer
        'attn_in_proj_w': jax.random.normal(ks[3], (3 * D, D), jnp.float32) * s,
        'attn_in_proj_b': jnp.zeros((3 * D,), jnp.float32),
        'attn_out_proj_w': jax.random.normal(ks[4], (D, D), jnp.float32) * s,
        'attn_out_proj_b': jnp.zeros((D,), jnp.float32),
        'output_w': jax.random.normal(ks[5], (1, D), jnp.float32) * s,        # output_layer
        'output_b': jnp.zeros((1,), jnp.float32),
        'number_w': jax.random.normal(ks[6], (1, D), jnp.float32) * s,        # number_layer (dead)
        'number_b': jnp.zeros((1,), jnp.float32),
        'global_embeddings': jnp.ones((D,), jnp.float32),                     # torch.ones init
    }


# --------------------------------------------------------------------------- #
# Pure-JAX reference (same math as the PyTorch module, no Pallas, no folding)
# --------------------------------------------------------------------------- #
def ref_forward(params, hyp_pad, ref_pad, ref_mask, hyp_num):
    B, Lr, _ = ref_pad.shape
    g = jnp.broadcast_to(params['global_embeddings'][None, None, :], (B, 1, D))
    w_in, b_in = params['attn_in_proj_w'], params['attn_in_proj_b']
    q = jnp.einsum('bqd,ed->bqe', g, w_in[:D], precision=_HP) + b_in[:D]
    k = jnp.einsum('bkd,ed->bke', ref_pad, w_in[D:2 * D], precision=_HP) + b_in[D:2 * D]
    v = jnp.einsum('bkd,ed->bke', ref_pad, w_in[2 * D:], precision=_HP) + b_in[2 * D:]
    qh = q.reshape(B, 1, NUM_HEADS, HEAD_DIM)
    kh = k.reshape(B, Lr, NUM_HEADS, HEAD_DIM)
    vh = v.reshape(B, Lr, NUM_HEADS, HEAD_DIM)
    s = jnp.einsum('bqhe,bkhe->bhqk', qh, kh, precision=_HP) / np.sqrt(HEAD_DIM)
    s = s + (ref_mask - 1e-09)[:, None, :, :]
    p = jax.nn.softmax(s, axis=-1)
    o = jnp.einsum('bhqk,bkhe->bqhe', p, vh, precision=_HP).reshape(B, 1, D)
    o = jnp.einsum('bqd,ed->bqe', o, params['attn_out_proj_w'], precision=_HP) \
        + params['attn_out_proj_b']
    o_rep = jnp.repeat(o, hyp_num, axis=0)
    x = hyp_pad + o_rep
    logits = jnp.einsum('bld,od->blo', x, params['output_w'],
                        precision=_HP)[..., 0] + params['output_b'][0]
    return jax.nn.sigmoid(9.0 * logits)


if __name__ == "__main__":
    key = jax.random.PRNGKey(0)
    pkey, dkey = jax.random.split(key)
    params = init_params(pkey)

    batch_size, hyp_num = 2, 2
    hyp_group_lengths = [3, 5, 2, 4]       # batch_size * hyp_num hypothesis groups
    ref_group_lengths = [4, 6]             # batch_size reference groups

    ks = jax.random.split(dkey, 6)
    n_hyp, n_ref = sum(hyp_group_lengths), sum(ref_group_lengths)
    hyp_tok = jax.random.randint(ks[0], (n_hyp,), 0, 10000)
    hyp_lab = jax.random.randint(ks[1], (n_hyp,), 0, 4)
    hyp_rel = jax.random.randint(ks[2], (n_hyp,), 0, 2)
    ref_tok = jax.random.randint(ks[3], (n_ref,), 0, 10000)
    ref_lab = jax.random.randint(ks[4], (n_ref,), 0, 4)
    ref_rel = jax.random.randint(ks[5], (n_ref,), 0, 2)

    hyp_pad, hyp_mask = embed_and_pad(hyp_tok, hyp_lab, hyp_rel, hyp_group_lengths, params)
    ref_pad, ref_mask = embed_and_pad(ref_tok, ref_lab, ref_rel, ref_group_lengths, params)

    score = entity_cross_encoder_forward(params, hyp_pad, hyp_mask,
                                         ref_pad, ref_mask, hyp_num)
    score = jax.block_until_ready(score)

    expected = ref_forward(params, hyp_pad, ref_pad, ref_mask, hyp_num)
    np.testing.assert_allclose(np.asarray(score), np.asarray(expected),
                               atol=2e-3, rtol=1e-3)
    assert score.shape == (batch_size * hyp_num, max(hyp_group_lengths))
    print("KERNEL_OK")
</pallas_src>

<mosaic_0001>
module attributes {stable_mosaic.version = 11 : i64} {
  func.func @_fused_kernel(%arg0: i32, %arg1: memref<1x6x32xf32, #tpu.memory_space<vmem>>, %arg2: memref<1x6x1xf32, #tpu.memory_space<vmem>>, %arg3: memref<1x10x32xf32, #tpu.memory_space<vmem>>, %arg4: memref<32x4xf32, #tpu.memory_space<vmem>>, %arg5: memref<1x4xf32, #tpu.memory_space<vmem>>, %arg6: memref<32x4xf32, #tpu.memory_space<vmem>>, %arg7: memref<1x4xf32, #tpu.memory_space<vmem>>, %arg8: memref<1x32xf32, #tpu.memory_space<vmem>>, %arg9: memref<1x1xf32, #tpu.memory_space<smem>>, %arg10: memref<1x1x10xf32, #tpu.memory_space<vmem>>) attributes {dimension_semantics = [#tpu.dimension_semantics<parallel>], iteration_bounds = array<i64: 2>, scalar_prefetch = 0 : i64, scratch_operands = 0 : i64, tpu.core_type = #tpu.core_type<tc>, window_params = [{transform_indices = @transform_0, window_bounds = array<i64: 1, 6, 32>}, {transform_indices = @transform_1, window_bounds = array<i64: 1, 6, 1>}, {transform_indices = @transform_2, window_bounds = array<i64: 1, 10, 32>}, {pipeline_mode = #tpu.pipeline_mode<synchronous>, transform_indices = @transform_3, window_bounds = array<i64: 32, 4>}, {pipeline_mode = #tpu.pipeline_mode<synchronous>, transform_indices = @transform_4, window_bounds = array<i64: 1, 4>}, {pipeline_mode = #tpu.pipeline_mode<synchronous>, transform_indices = @transform_5, window_bounds = array<i64: 32, 4>}, {pipeline_mode = #tpu.pipeline_mode<synchronous>, transform_indices = @transform_6, window_bounds = array<i64: 1, 4>}, {pipeline_mode = #tpu.pipeline_mode<synchronous>, transform_indices = @transform_7, window_bounds = array<i64: 1, 32>}, {transform_indices = @transform_8, window_bounds = array<i64: 1, 1>}, {transform_indices = @transform_9, window_bounds = array<i64: 1, 1, 10>}]} {
    %c0 = arith.constant 0 : index
    %c0_0 = arith.constant 0 : index
    %c0_1 = arith.constant 0 : index
    %0 = vector.load %arg1[%c0, %c0_0, %c0_1] : memref<1x6x32xf32, #tpu.memory_space<vmem>>, vector<1x6x32xf32>
    %1 = vector.shape_cast %0 : vector<1x6x32xf32> to vector<6x32xf32>
    %c0_2 = arith.constant 0 : index
    %c0_3 = arith.constant 0 : index
    %c0_4 = arith.constant 0 : index
    %2 = vector.load %arg2[%c0_2, %c0_3, %c0_4] : memref<1x6x1xf32, #tpu.memory_space<vmem>>, vector<1x6x1xf32>
    %3 = vector.shape_cast %2 : vector<1x6x1xf32> to vector<6x1xf32>
    %cst = arith.constant 9.99999971E-10 : f32
    %4 = vector.broadcast %cst : f32 to vector<6x1xf32>
    %5 = arith.subf %3, %4 : vector<6x1xf32>
    %c0_5 = arith.constant 0 : index
    %c0_6 = arith.constant 0 : index
    %6 = vector.load %arg4[%c0_5, %c0_6] : memref<32x4xf32, #tpu.memory_space<vmem>>, vector<32x4xf32>
    %cst_7 = arith.constant dense<0.000000e+00> : vector<6x4xf32>
    %7 = tpu.matmul %1, %6, %cst_7 {dimension_numbers = #tpu.dot_dimension_numbers<[1], [0], [0], [1], [0, 0, 1, 1], [], []>} : vector<6x32xf32>, vector<32x4xf32>, vector<6x4xf32> -> vector<6x4xf32>
    %c0_8 = arith.constant 0 : index
    %c0_9 = arith.constant 0 : index
    %8 = vector.load %arg5[%c0_8, %c0_9] : memref<1x4xf32, #tpu.memory_space<vmem>>, vector<1x4xf32>
    %9 = vector.broadcast %8 : vector<1x4xf32> to vector<6x4xf32>
    %10 = arith.addf %7, %9 : vector<6x4xf32>
    %11 = vector.broadcast %5 : vector<6x1xf32> to vector<6x4xf32>
    %12 = arith.addf %10, %11 : vector<6x4xf32>
    %cst_10 = arith.constant dense<0xFF800000> : vector<4xf32>
    %13 = vector.multi_reduction <maximumf>, %12, %cst_10 [0] : vector<6x4xf32> to vector<4xf32>
    %14 = vector.shape_cast %13 : vector<4xf32> to vector<1x4xf32>
    %15 = vector.broadcast %14 : vector<1x4xf32> to vector<6x4xf32>
    %16 = arith.subf %12, %15 : vector<6x4xf32>
    %17 = math.exp %16 : vector<6x4xf32>
    %cst_11 = arith.constant dense<0.000000e+00> : vector<4xf32>
    %18 = vector.multi_reduction <add>, %17, %cst_11 [0] : vector<6x4xf32> to vector<4xf32>
    %19 = vector.shape_cast %18 : vector<4xf32> to vector<1x4xf32>
    %20 = tpu.reciprocal %19 {approx = true} : vector<1x4xf32> -> vector<1x4xf32>
    %21 = vector.broadcast %20 : vector<1x4xf32> to vector<6x4xf32>
    %22 = arith.mulf %17, %21 : vector<6x4xf32>
    %c0_12 = arith.constant 0 : index
    %c0_13 = arith.constant 0 : index
    %23 = vector.load %arg6[%c0_12, %c0_13] : memref<32x4xf32, #tpu.memory_space<vmem>>, vector<32x4xf32>
    %cst_14 = arith.constant dense<0.000000e+00> : vector<6x4xf32>
    %24 = tpu.matmul %1, %23, %cst_14 {dimension_numbers = #tpu.dot_dimension_numbers<[1], [0], [0], [1], [0, 0, 1, 1], [], []>} : vector<6x32xf32>, vector<32x4xf32>, vector<6x4xf32> -> vector<6x4xf32>
    %c0_15 = arith.constant 0 : index
    %c0_16 = arith.constant 0 : index
    %25 = vector.load %arg7[%c0_15, %c0_16] : memref<1x4xf32, #tpu.memory_space<vmem>>, vector<1x4xf32>
    %26 = vector.broadcast %25 : vector<1x4xf32> to vector<6x4xf32>
    %27 = arith.addf %24, %26 : vector<6x4xf32>
    %28 = arith.mulf %22, %27 : vector<6x4xf32>
    %29 = vector.shape_cast %28 : vector<6x4xf32> to vector<1x6x4xf32>
    %cst_17 = arith.constant dense<0.000000e+00> : vector<1xf32>
    %30 = vector.multi_reduction <add>, %29, %cst_17 [1, 2] : vector<1x6x4xf32> to vector<1xf32>
    %31 = vector.shape_cast %30 : vector<1xf32> to vector<1x1x1xf32>
    %32 = vector.extract %31[0, 0, 0] : f32 from vector<1x1x1xf32>
    %33 = vector.broadcast %32 : f32 to vector<1x1xf32>
    %c0_18 = arith.constant 0 : index
    %c0_19 = arith.constant 0 : index
    %c0_20 = arith.constant 0 : index
    %34 = vector.load %arg3[%c0_18, %c0_19, %c0_20] : memref<1x10x32xf32, #tpu.memory_space<vmem>>, vector<1x10x32xf32>
    %35 = vector.shape_cast %34 : vector<1x10x32xf32> to vector<10x32xf32>
    %c0_21 = arith.constant 0 : index
    %c0_22 = arith.constant 0 : index
    %36 = vector.load %arg8[%c0_21, %c0_22] : memref<1x32xf32, #tpu.memory_space<vmem>>, vector<1x32xf32>
    "tpu.trace_start"() <{level = 10 : i32, message = "od,ld->ol"}> : () -> ()
    %cst_23 = arith.constant dense<0.000000e+00> : vector<1x10xf32>
    %37 = tpu.matmul %36, %35, %cst_23 {dimension_numbers = #tpu.dot_dimension_numbers<[1], [1], [0], [0], [0, 0, 1, 0], [], []>} : vector<1x32xf32>, vector<10x32xf32>, vector<1x10xf32> -> vector<1x10xf32>
    "tpu.trace_stop"() : () -> ()
    %38 = vector.broadcast %33 : vector<1x1xf32> to vector<1x10xf32>
    %39 = arith.addf %37, %38 : vector<1x10xf32>
    %c0_24 = arith.constant 0 : index
    %c0_25 = arith.constant 0 : index
    %40 = memref.load %arg9[%c0_24, %c0_25] : memref<1x1xf32, #tpu.memory_space<smem>>
    %41 = vector.broadcast %40 : f32 to vector<1x10xf32>
    %42 = arith.addf %39, %41 : vector<1x10xf32>
    %cst_26 = arith.constant 9.000000e+00 : f32
    %43 = vector.broadcast %cst_26 : f32 to vector<1x10xf32>
    %44 = arith.mulf %43, %42 : vector<1x10xf32>
    %45 = arith.negf %44 : vector<1x10xf32>
    %46 = math.exp %45 : vector<1x10xf32>
    %cst_27 = arith.constant 1.000000e+00 : f32
    %47 = vector.broadcast %cst_27 : f32 to vector<1x10xf32>
    %48 = arith.addf %47, %46 : vector<1x10xf32>
    %49 = arith.divf %47, %48 : vector<1x10xf32>
    %50 = vector.shape_cast %49 : vector<1x10xf32> to vector<1x1x10xf32>
    %c0_28 = arith.constant 0 : index
    %c0_29 = arith.constant 0 : index
    %c0_30 = arith.constant 0 : index
    %51 = vector.load %arg10[%c0_28, %c0_29, %c0_30] : memref<1x1x10xf32, #tpu.memory_space<vmem>>, vector<1x1x10xf32>
    tpu.vector_store %arg10[%c0_28, %c0_29, %c0_30], %50 {strides = array<i32>} : memref<1x1x10xf32, #tpu.memory_space<vmem>>, vector<1x1x10xf32>,
    return
  }
  func.func @transform_0(%arg0: i32) -> (i32, i32, i32) {
    %c0_i32 = arith.constant 0 : i32
    %c0_i32_0 = arith.constant 0 : i32
    %c0_i32_1 = arith.constant 0 : i32
    return %arg0, %c0_i32, %c0_i32_0 : i32, i32, i32
  }
  func.func @transform_1(%arg0: i32) -> (i32, i32, i32) {
    %c0_i32 = arith.constant 0 : i32
    %c0_i32_0 = arith.constant 0 : i32
    %c0_i32_1 = arith.constant 0 : i32
    return %arg0, %c0_i32, %c0_i32_0 : i32, i32, i32
  }
  func.func @transform_2(%arg0: i32) -> (i32, i32, i32) {
    %c0_i32 = arith.constant 0 : i32
    %c0_i32_0 = arith.constant 0 : i32
    %c0_i32_1 = arith.constant 0 : i32
    return %arg0, %c0_i32, %c0_i32_0 : i32, i32, i32
  }
  func.func @transform_3(%arg0: i32) -> (i32, i32) {
    %c0_i32 = arith.constant 0 : i32
    %c0_i32_0 = arith.constant 0 : i32
    %c0_i32_1 = arith.constant 0 : i32
    return %c0_i32, %c0_i32_0 : i32, i32
  }
  func.func @transform_4(%arg0: i32) -> (i32, i32) {
    %c0_i32 = arith.constant 0 : i32
    %c0_i32_0 = arith.constant 0 : i32
    %c0_i32_1 = arith.constant 0 : i32
    return %c0_i32, %c0_i32_0 : i32, i32
  }
  func.func @transform_5(%arg0: i32) -> (i32, i32) {
    %c0_i32 = arith.constant 0 : i32
    %c0_i32_0 = arith.constant 0 : i32
    %c0_i32_1 = arith.constant 0 : i32
    return %c0_i32, %c0_i32_0 : i32, i32
  }
  func.func @transform_6(%arg0: i32) -> (i32, i32) {
    %c0_i32 = arith.constant 0 : i32
    %c0_i32_0 = arith.constant 0 : i32
    %c0_i32_1 = arith.constant 0 : i32
    return %c0_i32, %c0_i32_0 : i32, i32
  }
  func.func @transform_7(%arg0: i32) -> (i32, i32) {
    %c0_i32 = arith.constant 0 : i32
    %c0_i32_0 = arith.constant 0 : i32
    %c0_i32_1 = arith.constant 0 : i32
    return %c0_i32, %c0_i32_0 : i32, i32
  }
  func.func @transform_8(%arg0: i32) -> (i32, i32) {
    %c0_i32 = arith.constant 0 : i32
    %c0_i32_0 = arith.constant 0 : i32
    %c0_i32_1 = arith.constant 0 : i32
    return %c0_i32, %c0_i32_0 : i32, i32
  }
  func.func @transform_9(%arg0: i32) -> (i32, i32, i32) {
    %c0_i32 = arith.constant 0 : i32
    %c0_i32_0 = arith.constant 0 : i32
    %c0_i32_1 = arith.constant 0 : i32
    return %arg0, %c0_i32, %c0_i32_0 : i32, i32, i32
  }
}

</mosaic_0001>

<bundles_post_ra>
// kernel: entity_cross_encoder_forward.1
= control target key start
LH: loop header
LB: loop body
LE: loop exit
PB: predicated region body
PF: predicated region fallthrough
CT: control target
= control target key end

     0   :  { %s696_s11 = smov 0   ;;  %s765_s0 = inlined_call_operand.vmem [shape: f32[2,6,32], index: 0, kind: input, shape index: {}]   ;;  %s766_s1 = inlined_call_operand.vmem [shape: f32[2,6,1], index: 1, kind: input, shape index: {}]   ;;  %s767_s2 = inlined_call_operand.vmem [shape: f32[2,10,32], index: 2, kind: input, shape index: {}]   ;;  %s768_s3 = inlined_call_operand.vmem [shape: f32[32,4], index: 3, kind: input, shape index: {}]   ;;  %s769_s4 = inlined_call_operand.vmem [shape: f32[1,4], index: 4, kind: input, shape index: {}]   ;;  %s770_s5 = inlined_call_operand.vmem [shape: f32[32,4], index: 5, kind: input, shape index: {}]   ;;  %s771_s6 = inlined_call_operand.vmem [shape: f32[1,4], index: 6, kind: input, shape index: {}]   ;;  %s772_s7 = inlined_call_operand.vmem [shape: f32[1,32], index: 7, kind: input, shape index: {}]   ;;  %s773_s8 = inlined_call_operand.<no memory space> [shape: f32[1,1], index: 8, kind: input, shape index: {}]   ;;  %s774_s9 = inlined_call_operand.vmem [shape: f32[2,1,10], index: 9, kind: output, shape index: {}]  }
   0x1   :  { %14 = sst [smem:[#allocation2]] %s773_s8 }
   0x2 LB: > { %s593_s12 = sadd.s32 4294967295, %s640_s11   ;;  %p597_p0 = scmp.ge.s32.totalorder %s640_s11, 1  ;;  %s640_s11 = sphi %s696_s11, %s20_s11  }
   0x3   : > { %p306_p1 = scmp.lt.s32.totalorder %s640_s11, 3 }
   0x5   : > { %p307_p2 = pnand %p597_p0, %p306_p1 }
   0x6   : > { %p348_p3 = scmp.lt.s32.totalorder (!%p307_p2), %s593_s12, 1  ;;  %s497_s25 = sld [smem:[#allocation2]] (!%p307_p2) }
   0x7   : > { %310 = sbr.rel (%p307_p2) target bundleno = 413 (0x19d), region = 56 }
   0xc   : > { %v370_v0 = vld [vmem:[%s768_s3 + $0x18] sm:$0xff]  ;;  %v369_v1 = vld [vmem:[%s768_s3 + $0x10] sm:$0xff]  ;;  %v642_v2 = vmov 0   ;;  %v368_v5 = vld [vmem:[%s768_s3 + $0x8] sm:$0xff]  ;;  %s776_s12 = smov (!%p348_p3, %s593_s12), 1  ;;  %vm375_vm0 = vcmask 261120   ;;  %v498_v53 = vstv %s497_s25 }
   0xd   : > { %391 = vmatpush.msra.mxu0 %v370_v0  ;;  %623 = vset.pattern.permute.xlu0 %v642_v2  ;;  %v428_v3 = vld [vmem:[%s770_s5 + $0x18] sm:$0xff]  ;;  %v427_v4 = vld [vmem:[%s770_s5 + $0x10] sm:$0xff]  ;;  %v426_v6 = vld [vmem:[%s770_s5 + $0x8] sm:$0xff]  ;;  %s598_s26 = sshll.u32 %s776_s12, 3  ;;  %vm405_vm1 = vcmask 29696   ;;  %s611_s17 = sshll.u32 %s776_s12, 4 }
   0xe   : > { %445 = vmatpush.msra.mxu1 %v428_v3  ;;  %v367_v7 = vld [vmem:[%s768_s3] sm:$0xff]  ;;  %s351_s29 = scalar_lea.vmem %s765_s0, %s598_s26  ;;  %s355_s13 = scalar_lea.vmem %s766_s1, %s598_s26  ;;  %vm520_vm5 = vcmask 73728  }
   0xf   : > { %392 = vmatpush.msra.mxu0 %v369_v1  ;;  %v425_v8 = vld [vmem:[%s770_s5] sm:$0xff]  ;;  %s360_s20 = scalar_lea.vmem %s767_s2, %s611_s17 }
  0x10   : > { %446 = vmatpush.msra.mxu1 %v427_v4  ;;  %v364_v9 = vld [vmem:[%s351_s29] sm:$0x3f]  ;;  %v465_v26 = vld [vmem:[%s360_s20 + $0x8] sm:$0x3]  ;;  %s363_s29 = scalar_lea.vmem %s774_s9, %s776_s12 }
  0x11   : > { %393 = vmatpush.msra.mxu0 %v368_v5  ;;  %v365_v10 = vld [vmem:[%s355_s13] sm:$0x3f]  ;;  %605 = vmatpush.xpose.msk.msra.mxu2 %vm375_vm0, %v465_v26 }
  0x12   : > { %447 = vmatpush.msra.mxu1 %v426_v6  ;;  %v602_v11 = vadd.f32 -1e-09, %v365_v10  ;;  %v624_v12 = vld [vmem:[%s769_s4] ss:$0 sm:$0xff] }
  0x13   : > { %394 = vmatpush.msra.mxu0 %v367_v7  ;;  %v464_v27 = vld [vmem:[%s360_s20] sm:$0xff] }
  0x14   : > { %603 = vmatmul.msk.f32.vlgmr.msra.gmra.mxu0 %vm375_vm0, %v364_v9  ;;  %448 = vmatpush.msra.mxu1 %v425_v8  ;;  %v466_v28 = vld [vmem:[%s772_s7] sm:$0x1] }
  0x15   : > { %401 = vperm.xlu0 %623, %v602_v11   ;;  %604 = vmatmul.msk.f32.vlgmr.msra.gmra.mxu1 %vm375_vm0, %v364_v9  ;;  %v625_v37 = vld [vmem:[%s771_s6] ss:$0 sm:$0xff] }
  0x16   : > { %606 = vmatpush.xpose.msk.msra.mxu2 %vm375_vm0, %v464_v27 }
  0x19   : > { %607 = vmatmul.msk.f32.vlgmr.msra.gmra.mxu2 %vm375_vm0, %v466_v28 }
  0x87   : > { %v402_v14 = vpop.permute.xlu0 %401 }
  0x91   : > { %v396_v13 = vpop.f32.mrf.mxu0 }
  0x92   : > { %v397_v15 = vadd.f32 %v624_v12, %v396_v13  ;;  %v450_v38 = vpop.f32.mrf.mxu1 }
  0x93   : > { %v451_v39 = vadd.f32 %v625_v37, %v450_v38 }
  0x94   : > { %v404_v16 = vadd.f32 %v402_v14, %v397_v15 }
  0x96   : > { %v406_v17 = vsel %vm405_vm1, %v404_v16, -inf }
  0x97   : > { %v407_v18 = vrot.slane %v406_v17, 4 }
  0x99   : > { %v408_v19 = vmax.f32 %v406_v17, %v407_v18 }
  0x9b   : > { %v409_v20 = vrot.slane %v408_v19, 2 }
  0x9c   : > { %v494_v51 = vpop.f32.mrf.mxu2 }
  0x9d   : > { %v410_v21 = vmax.f32 %v408_v19, %v409_v20 }
  0x9f   : > { %v411_v22 = vrot.slane %v410_v21, 1 }
  0xa1   : > { %v412_v23 = vmax.f32 %v410_v21, %v411_v22 }
  0xa3   : > { %v413_v24 = vsub.f32 %v404_v16, %v412_v23 }
  0xa5   : > { %v414_v25 = vmul.f32 1.442695, %v413_v24 }
  0xa7   : > { %626 = vpow2.f32 %v414_v25 }
  0xad   : > { %v627_v29 = vpop.eup %626 }
  0xae   : > { %v416_v30 = vsel %vm405_vm1, %v627_v29, 0.0 }
  0xaf   : > { %v417_v31 = vrot.slane %v416_v30, 4 }
  0xb1   : > { %v418_v32 = vadd.f32 %v417_v31, %v416_v30 }
  0xb3   : > { %v419_v33 = vrot.slane %v418_v32, 2 }
  0xb5   : > { %v420_v34 = vadd.f32 %v419_v33, %v418_v32 }
  0xb7   : > { %v421_v35 = vrot.slane %v420_v34, 1 }
  0xb9   : > { %v422_v36 = vadd.f32 %v421_v35, %v420_v34 }
  0xbb   : > { %628 = vrcp.f32 %v422_v36 }
  0xc1   : > { %v629_v40 = vpop.eup %628 }
  0xc2   : > { %v424_v41 = vmul.f32 %v629_v40, %v627_v29 }
  0xc4   : > { %v453_v42 = vmul.f32 %v451_v39, %v424_v41 }
  0xc6   : > { %v454_v43 = vsel %vm405_vm1, %v453_v42, 0.0 }
  0xc7   : > { %455 = vadd.xlane.f32.xlu0 %v454_v43 }
 0x13a   : > { %v456_v44 = vpop.xlane.xlu0 %455 }
 0x13b   : > { %v457_v45 = vrot.slane %v456_v44, 4 }
 0x13d   : > { %v458_v46 = vadd.f32 %v457_v45, %v456_v44 }
 0x13f   : > { %v459_v47 = vrot.slane %v458_v46, 2 }
 0x141   : > { %v460_v48 = vadd.f32 %v459_v47, %v458_v46 }
 0x143   : > { %v461_v49 = vrot.slane %v460_v48, 1 }
 0x145   : > { %v462_v50 = vadd.f32 %v461_v49, %v460_v48 }
 0x147   : > { %612 = vpush %v462_v50 }
 0x178   : > { %s613_s26 = spop %612 }
 0x179   : > { %v467_v52 = vstv %s613_s26 }
 0x17a   : > { %v495_v54 = vadd.f32 %v494_v51, %v467_v52 }
 0x17c   : > { %v499_v55 = vadd.f32 %v498_v53, %v495_v54 }
 0x17e   : > { %v608_v56 = vmul.f32 -9.0, %v499_v55 }
 0x180   : > { %v502_v57 = vmul.f32 1.442695, %v608_v56 }
 0x182   : > { %630 = vpow2.f32 %v502_v57 }
 0x188   : > { %v631_v58 = vpop.eup %630 }
 0x189   : > { %v504_v59 = vadd.f32 1.0, %v631_v58 }
 0x18b   : > { %632 = vrcp.f32 %v504_v59  ;;  %v516_v63 = vand.u32 2147483648, %v504_v59  ;;  %v514_v1 = vand.u32 2147483647, %v504_v59  ;;  %vm510_vm3 = vweird.f32 %v504_v59 }
 0x18d   : > { %v517_v3 = vor.u32 1.1754944e-38, %v516_v63  ;;  %vm515_vm6 = vcmp.eq.f32.partialorder %v514_v1, 8.507059e+37 }
 0x191   : > { %v633_v60 = vpop.eup %632 }
 0x192   : > { %v506_v61 = vmul.f32 %v633_v60, %v504_v59  ;;  %vm511_vm2 = vweird.f32 %v633_v60 }
 0x193   : > { %vm512_vm4 = vmor %vm510_vm3, %vm511_vm2 }
 0x194   : > { %v507_v62 = vsub.f32 1.0, %v506_v61 }
 0x196   : > { %v508_v0 = vmul.f32 %v633_v60, %v507_v62 }
 0x198   : > { %v509_v2 = vadd.f32 %v633_v60, %v508_v0 }
 0x19a   : > { %v513_v4 = vsel %vm512_vm4, %v633_v60, %v509_v2 }
 0x19b   : > { %v518_v5 = vsel %vm515_vm6, %v517_v3, %v513_v4 }
 0x19c   : > { %521 = vst.msk [vmem:[%s363_s29] sm:$0x1] %vm520_vm5, %v518_v5 }
 0x19d PF: > { %s20_s11 = sadd.s32 1, %s640_s11  }
 0x19e   : > { %p17_p4 = scmp.ge.s32.totalorder %s20_s11, 4  }
 0x1a0   :  { %19 = sbr.rel (!%p17_p4) target bundleno = 2 (0x2), region = 92 }

</bundles_post_ra>
